<compile_context>
chip_gen: v5e
topology: v5e:2x2
jax: 0.10.0
libtpu: 0.0.40
codegen_flags: <defaults>
</compile_context>

<pallas_src>
import functools

import jax
import jax.numpy as jnp
from jax import lax
from jax.experimental import pallas as pl
from jax.experimental.pallas import tpu as pltpu

EPS = 1e-5


# ------------------------------ small helpers ------------------------------ #

def _round_up(x, m):
    return (x + m - 1) // m * m


def _tpu_vmem_capacity():
    """Per-chip VMEM capacity (bytes); conservative fallback if query fails."""
    try:
        info = pltpu.get_tpu_info()
        for name in ("vmem_capacity_bytes", "vmem_bytes", "vmem_capacity"):
            v = getattr(info, name, None)
            if v:
                return int(v)
    except Exception:
        pass
    return 64 * 1024 * 1024          # v7x per-TC size (safe everywhere)


_VMEM_PHYS = _tpu_vmem_capacity()
_VMEM_LIMIT = int(min(_VMEM_PHYS * 3 // 4, 100 * 1024 * 1024))        # scoped-VMEM ceiling
_MATMUL_VMEM_BUDGET = int(min(_VMEM_PHYS // 2, 64 * 1024 * 1024))      # 1x1-conv tile chooser
_ROWBLOCK_VMEM_BUDGET = int(min(_VMEM_PHYS // 4, 32 * 1024 * 1024))    # conv2 / pool row blocks


def _choose_tm(m, per_row_bytes, fixed_bytes):
    """Largest row tile (multiple of 8, <=2048) fitting the per-chip VMEM
    budget; prefers tiles that divide m so no padding copy is needed."""
    cap = max(8, min(_round_up(m, 8), 2048))
    best_any, best_div = 8, None
    tm = 8
    while tm <= cap:
        if fixed_bytes + tm * per_row_bytes <= _MATMUL_VMEM_BUDGET:
            best_any = tm
            if m % tm == 0:
                best_div = tm
        tm += 8
    if best_div is not None and 2 * best_div >= best_any:
        return best_div
    return best_any


def _choose_conv2_th(ho, w, s, cp, coutp, itemsize):
    """Output-row block for the fused 3x3 kernel: largest divisor of HO whose
    per-step working set fits the budget, stopping early once the matmul M is
    MXU-sized and >=2 grid steps remain (pipelining)."""
    wo = w // s
    best = 1
    for th in range(1, ho + 1):
        if ho % th:
            continue
        bh = th * s
        var_bytes = ((bh + 2) * (w + 2) * cp + bh * w * 3 * cp) * itemsize \
                    + 2 * bh * w * coutp * 4 + 2 * th * wo * coutp * itemsize
        if var_bytes > _ROWBLOCK_VMEM_BUDGET:
            break
        best = th
        if bh * w >= 1024 and ho // th >= 2:
            break
    return best


def _choose_pool_th(ho, w, s, cin, cout, itemsize):
    wo = w // s
    best = 1
    for th in range(1, ho + 1):
        if ho % th:
            continue
        bh = th * s
        var_bytes = 2 * bh * w * cin * itemsize + bh * w * cin * 4 \
                    + th * wo * cin * 4 + 2 * th * wo * cout * 4
        if var_bytes > _ROWBLOCK_VMEM_BUDGET:
            break
        best = th
        if th * wo >= 512 and ho // th >= 2:
            break
    return best


# ------------------------------ Pallas kernels ------------------------------ #

def _matmul_bias_kernel(x_ref, w_ref, b_ref, o_ref, *, relu):
    """out = x @ w_folded + bias ; optional ReLU.  (BN scale pre-folded in w.)"""
    y = jnp.dot(x_ref[...], w_ref[...], preferred_element_type=jnp.float32)
    y = y + b_ref[...]
    if relu:
        y = jnp.maximum(y, 0.0)
    o_ref[...] = y.astype(o_ref.dtype)


def _matmul_bias_add_relu_kernel(x_ref, w_ref, b_ref, r_ref, o_ref):
    """out = relu(x @ w_folded + bias + residual)   (conv3 + bn3 + add + relu3)."""
    y = jnp.dot(x_ref[...], w_ref[...], preferred_element_type=jnp.float32)
    y = y + b_ref[...] + r_ref[...].astype(jnp.float32)
    o_ref[...] = jnp.maximum(y, 0.0).astype(o_ref.dtype)


def _conv3x3_bn_relu_pool_kernel(xp_ref, w_ref, b_ref, o_ref, *, S):
    """Fused conv2(3x3, pad=1) + bn2(bias) + relu2 + AvgPool2d(S), one row block.

    xp_ref : (H+2, W+2, CP)   zero-padded activation (one image, batch squeezed)
    w_ref  : (3, 3*CP, COUTP) per-kh weights; within a kh the 3 kw taps are
                              stacked along K (kw-major, then channel)
    b_ref  : (1, COUTP)       f32 bias
    o_ref  : (TH, WO, COUTP)  output row block
    """
    TH, WO, COUTP = o_ref.shape
    W = xp_ref.shape[1] - 2
    CP = xp_ref.shape[2]
    BH = TH * S

    j = pl.program_id(1)
    r0 = pl.multiple_of(j * BH, BH)
    slab = xp_ref[pl.ds(r0, BH + 2), :, :]                    # (BH+2, W+2, CP)

    acc = None
    for kh in range(3):                                       # static unroll: 3 MXU matmuls
        rows = slab[kh:kh + BH]                               # (BH, W+2, CP)
        lhs = jnp.concatenate(
            [rows[:, 0:W, :], rows[:, 1:W + 1, :], rows[:, 2:W + 2, :]],
            axis=-1).reshape(BH * W, 3 * CP)                  # (BH*W, 3*CP)
        part = jnp.dot(lhs, w_ref[kh], preferred_element_type=jnp.float32)
        acc = part if acc is None else acc + part             # (BH*W, COUTP) f32

    acc = jnp.maximum(acc + b_ref[...], 0.0)                  # bn bias + relu

    if S > 1:                                                 # avg pool on the VPU
        t = jnp.sum(acc.reshape(BH * WO, S, COUTP), axis=1)   # pool along W
        t = jnp.sum(t.reshape(TH, S, WO, COUTP), axis=1)      # pool along H
        t = t * (1.0 / (S * S))
    else:
        t = acc.reshape(TH, WO, COUTP)
    o_ref[...] = t.astype(o_ref.dtype)


def _pool_conv_bn_kernel(x_ref, w_ref, b_ref, o_ref, *, S):
    """Fused downsample: AvgPool2d(S) + 1x1 conv + BN (no relu), one row block.

    x_ref: (TH*S, W, CIN); w_ref: (CIN, COUT); b_ref: (1, COUT)
    o_ref: (TH, WO, COUT)
    """
    TH, WO, COUT = o_ref.shape
    BH, W, CIN = x_ref.shape

    x = x_ref[...].astype(jnp.float32)
    if S > 1:
        t = jnp.sum(x.reshape(BH * WO, S, CIN), axis=1)       # pool along W
        t = jnp.sum(t.reshape(TH, S, WO, CIN), axis=1)        # pool along H
        t = t * (1.0 / (S * S))
    else:
        t = x
    pooled = t.reshape(TH * WO, CIN).astype(w_ref.dtype)
    y = jnp.dot(pooled, w_ref[...], preferred_element_type=jnp.float32) + b_ref[...]
    o_ref[...] = y.reshape(TH, WO, COUT).astype(o_ref.dtype)


# ------------------------------ Pallas wrappers ----------------------------- #

def matmul_bias(x2d, w, bias, *, relu, out_dtype):
    m, k = x2d.shape
    cout = w.shape[-1]
    di = x2d.dtype.itemsize
    do = jnp.dtype(out_dtype).itemsize
    per_row = 2 * k * di + 2 * cout * do + cout * 4
    fixed = 2 * k * cout * w.dtype.itemsize + 2 * cout * 4
    tm = _choose_tm(m, per_row, fixed)
    mp = _round_up(m, tm)
    xin = x2d if mp == m else jnp.pad(x2d, ((0, mp - m), (0, 0)))
    out = pl.pallas_call(
        functools.partial(_matmul_bias_kernel, relu=relu),
        out_shape=jax.ShapeDtypeStruct((mp, cout), out_dtype),
        grid=(mp // tm,),
        in_specs=[
            pl.BlockSpec((tm, k), lambda i: (i, 0)),
            pl.BlockSpec((k, cout), lambda i: (0, 0)),
            pl.BlockSpec((1, cout), lambda i: (0, 0)),
        ],
        out_specs=pl.BlockSpec((tm, cout), lambda i: (i, 0)),
        compiler_params=pltpu.CompilerParams(
            dimension_semantics=("parallel",), vmem_limit_bytes=_VMEM_LIMIT),
        cost_estimate=pl.CostEstimate(
            flops=int(2 * mp * k * cout), transcendentals=0,
            bytes_accessed=int((mp * k + k * cout) * di
                               + mp * cout * jnp.dtype(out_dtype).itemsize)),
    )(xin, w, bias)
    return out if mp == m else out[:m]


def matmul_bias_add_relu(x2d, w, bias, res2d, *, out_dtype):
    m, k = x2d.shape
    cout = w.shape[-1]
    di = x2d.dtype.itemsize
    dr = res2d.dtype.itemsize
    do = jnp.dtype(out_dtype).itemsize
    per_row = 2 * k * di + 2 * cout * dr + 2 * cout * do + cout * 4
    fixed = 2 * k * cout * w.dtype.itemsize + 2 * cout * 4
    tm = _choose_tm(m, per_row, fixed)
    mp = _round_up(m, tm)
    if mp != m:
        x2d = jnp.pad(x2d, ((0, mp - m), (0, 0)))
        res2d = jnp.pad(res2d, ((0, mp - m), (0, 0)))
    out = pl.pallas_call(
        _matmul_bias_add_relu_kernel,
        out_shape=jax.ShapeDtypeStruct((mp, cout), out_dtype),
        grid=(mp // tm,),
        in_specs=[
            pl.BlockSpec((tm, k), lambda i: (i, 0)),
            pl.BlockSpec((k, cout), lambda i: (0, 0)),
            pl.BlockSpec((1, cout), lambda i: (0, 0)),
            pl.BlockSpec((tm, cout), lambda i: (i, 0)),
        ],
        out_specs=pl.BlockSpec((tm, cout), lambda i: (i, 0)),
        compiler_params=pltpu.CompilerParams(
            dimension_semantics=("parallel",), vmem_limit_bytes=_VMEM_LIMIT),
        cost_estimate=pl.CostEstimate(
            flops=int(2 * mp * k * cout), transcendentals=0,
            bytes_accessed=int((mp * k + k * cout) * di + mp * cout * dr
                               + mp * cout * jnp.dtype(out_dtype).itemsize)),
    )(x2d, w, bias, res2d)
    return out if mp == m else out[:m]


def conv3x3_bn_relu_pool(x_nhwc, w2, b2, stride):
    """Fused conv2 + bn2 + relu2 + avgpool(stride); grid over (batch, row blocks)."""
    n, h, w, cp = x_nhwc.shape
    coutp = w2.shape[-1]
    s = stride
    ho, wo = h // s, w // s
    th = _choose_conv2_th(ho, w, s, cp, coutp, x_nhwc.dtype.itemsize)
    hb = ho // th

    # TODO(synk): halo pad is a JAX-side copy; fold into the kernel for huge images.
    xp = jnp.pad(x_nhwc, ((0, 0), (1, 1), (1, 1), (0, 0)))

    return pl.pallas_call(
        functools.partial(_conv3x3_bn_relu_pool_kernel, S=s),
        out_shape=jax.ShapeDtypeStruct((n, ho, wo, coutp), x_nhwc.dtype),
        grid=(n, hb),
        in_specs=[
            pl.BlockSpec((None, h + 2, w + 2, cp), lambda i, j: (i, 0, 0, 0)),
            pl.BlockSpec((3, 3 * cp, coutp), lambda i, j: (0, 0, 0)),
            pl.BlockSpec((1, coutp), lambda i, j: (0, 0)),
        ],
        out_specs=pl.BlockSpec((None, th, wo, coutp), lambda i, j: (i, j, 0, 0)),
        compiler_params=pltpu.CompilerParams(
            dimension_semantics=("parallel", "arbitrary"),
            vmem_limit_bytes=_VMEM_LIMIT),
        cost_estimate=pl.CostEstimate(
            flops=int(2 * n * h * w * 9 * cp * coutp), transcendentals=0,
            bytes_accessed=int((n * (h + 2) * (w + 2) * cp + 9 * cp * coutp
                                + n * ho * wo * coutp) * x_nhwc.dtype.itemsize)),
    )(xp, w2, b2)


def downsample_pool_conv_bn(x_nhwc, w, bias, stride, *, out_dtype):
    """Fused identity path: AvgPool2d(stride) + 1x1 conv + BN; grid over (batch, row blocks)."""
    n, h, ww, cin = x_nhwc.shape
    cout = w.shape[-1]
    s = stride
    ho, wo = h // s, ww // s
    th = _choose_pool_th(ho, ww, s, cin, cout, x_nhwc.dtype.itemsize)
    hb = ho // th
    return pl.pallas_call(
        functools.partial(_pool_conv_bn_kernel, S=s),
        out_shape=jax.ShapeDtypeStruct((n, ho, wo, cout), out_dtype),
        grid=(n, hb),
        in_specs=[
            pl.BlockSpec((None, th * s, ww, cin), lambda i, j: (i, j, 0, 0)),
            pl.BlockSpec((cin, cout), lambda i, j: (0, 0)),
            pl.BlockSpec((1, cout), lambda i, j: (0, 0)),
        ],
        out_specs=pl.BlockSpec((None, th, wo, cout), lambda i, j: (i, j, 0, 0)),
        compiler_params=pltpu.CompilerParams(
            dimension_semantics=("parallel", "arbitrary"),
            vmem_limit_bytes=_VMEM_LIMIT),
        cost_estimate=pl.CostEstimate(
            flops=int(2 * n * ho * wo * cin * cout + n * h * ww * cin),
            transcendentals=0,
            bytes_accessed=int((n * h * ww * cin + cin * cout) * x_nhwc.dtype.itemsize
                               + n * ho * wo * cout * jnp.dtype(out_dtype).itemsize)),
    )(x_nhwc, w, bias)


# ------------------------------- glue (JAX) --------------------------------- #

def fold_bn(gamma, beta, mean, var, eps=EPS):
    scale = gamma / jnp.sqrt(var + eps)
    return scale, beta - mean * scale


def prep_kernel_params(p, compute_dtype):
    """Torch OIHW conv weights + BN stats -> folded matmul weights in compute
    dtype and f32 biases.  The intermediate channel dim (planes) is zero-padded
    to a multiple of 128 so intermediate tensors are lane-dense; the padding
    channels stay exactly zero through conv1 -> conv2 -> conv3."""
    planes = p["conv1"].shape[0]
    planes_p = _round_up(planes, 128)
    pad_c = planes_p - planes

    kp = {"planes": planes, "planes_p": planes_p}

    # conv1 (1x1) + bn1, output channels padded to planes_p (zero cols / bias).
    s1, b1 = fold_bn(*p["bn1"])
    w1 = p["conv1"][:, :, 0, 0].T * s1[None, :]                      # (Cin, planes)
    kp["w1"] = jnp.pad(w1, ((0, 0), (0, pad_c))).astype(compute_dtype)
    kp["b1"] = jnp.pad(b1, (0, pad_c)).reshape(1, -1).astype(jnp.float32)

    # conv2 (3x3) + bn2: (kh, kw, cin, cout) padded on cin and cout, then the
    # kw taps are folded into K -> (3, 3*planes_p, planes_p).
    s2, b2 = fold_bn(*p["bn2"])
    w2 = jnp.transpose(p["conv2"], (2, 3, 1, 0)) * s2[None, None, None, :]
    w2 = jnp.pad(w2, ((0, 0), (0, 0), (0, pad_c), (0, pad_c)))
    kp["w2"] = w2.reshape(3, 3 * planes_p, planes_p).astype(compute_dtype)
    kp["b2"] = jnp.pad(b2, (0, pad_c)).reshape(1, -1).astype(jnp.float32)

    # conv3 (1x1) + bn3: K padded with zero rows to consume the padded planes.
    s3, b3 = fold_bn(*p["bn3"])
    w3 = p["conv3"][:, :, 0, 0].T * s3[None, :]                      # (planes, 4*planes)
    kp["w3"] = jnp.pad(w3, ((0, pad_c), (0, 0))).astype(compute_dtype)
    kp["b3"] = b3.reshape(1, -1).astype(jnp.float32)

    # downsample 1x1 conv + BN (if present).
    if p["convd"] is not None:
        sd, bd = fold_bn(*p["bnd"])
        wd = p["convd"][:, :, 0, 0].T * sd[None, :]                  # (Cin, 4*planes)
        kp["wd"] = wd.astype(compute_dtype)
        kp["bd"] = bd.reshape(1, -1).astype(jnp.float32)
    else:
        kp["wd"] = None
    return kp


def bottleneck_forward(x_nchw, kp, stride, *, compute_dtype=jnp.bfloat16):
    """Pallas-backed Bottleneck forward. Input/output are NCHW like PyTorch."""
    x = jnp.transpose(x_nchw, (0, 2, 3, 1))                 # NHWC, f32
    n, h, w, cin = x.shape
    planes, planes_p = kp["planes"], kp["planes_p"]
    assert h % stride == 0 and w % stride == 0, "AvgPool2d needs H, W divisible by stride"

    xc = x.astype(compute_dtype)

    # conv1 (1x1) + bn1 + relu1
    out = matmul_bias(xc.reshape(n * h * w, cin), kp["w1"], kp["b1"],
                      relu=True, out_dtype=compute_dtype).reshape(n, h, w, planes_p)

    # conv2 (3x3, pad=1) + bn2 + relu2 + avgpool(stride), fused
    out = conv3x3_bn_relu_pool(out, kp["w2"], kp["b2"], stride)
    n2, h2, w2_, _ = out.shape

    # identity path (kept in f32)
    if kp["wd"] is not None:
        if stride > 1:
            identity = downsample_pool_conv_bn(xc, kp["wd"], kp["bd"], stride,
                                               out_dtype=jnp.float32)
            identity = identity.reshape(n2 * h2 * w2_, -1)
        else:
            identity = matmul_bias(xc.reshape(n * h * w, cin), kp["wd"], kp["bd"],
                                   relu=False, out_dtype=jnp.float32)
    else:
        assert stride == 1 and cin == planes * 4, "identity shortcut needs matching shapes"
        identity = x.reshape(n2 * h2 * w2_, cin)

    # conv3 (1x1) + bn3 + residual add + relu3, fused
    out = matmul_bias_add_relu(out.reshape(n2 * h2 * w2_, planes_p),
                               kp["w3"], kp["b3"], identity, out_dtype=jnp.float32)
    out = out.reshape(n2, h2, w2_, planes * 4)
    return jnp.transpose(out, (0, 3, 1, 2))                 # back to NCHW


# --------------------------- pure-JAX reference ----------------------------- #

def ref_forward(x, p, stride, eps=EPS):
    def conv(x, w, pad):
        return lax.conv_general_dilated(
            x, w, (1, 1), pad, dimension_numbers=("NCHW", "OIHW", "NCHW"))

    def bn(x, stats):
        gamma, beta, mean, var = stats
        s = gamma / jnp.sqrt(var + eps)
        b = beta - mean * s
        return x * s[None, :, None, None] + b[None, :, None, None]

    def avgp(x, s):
        if s == 1:
            return x
        n, c, h, w = x.shape
        return x.reshape(n, c, h // s, s, w // s, s).mean(axis=(3, 5))

    out = jax.nn.relu(bn(conv(x, p["conv1"], "VALID"), p["bn1"]))
    out = jax.nn.relu(bn(conv(out, p["conv2"], ((1, 1), (1, 1))), p["bn2"]))
    out = avgp(out, stride)
    out = bn(conv(out, p["conv3"], "VALID"), p["bn3"])
    identity = x
    if p["convd"] is not None:
        identity = bn(conv(avgp(x, stride), p["convd"], "VALID"), p["bnd"])
    return jax.nn.relu(out + identity)


# ---------------------------- deterministic init ---------------------------- #

def init_params(key, inplanes, planes, stride):
    expansion = 4
    keys = jax.random.split(key, 8)

    def bn_params(k, c):
        k1, k2, k3, k4 = jax.random.split(k, 4)
        gamma = jax.random.uniform(k1, (c,), jnp.float32, 0.5, 1.5)
        beta = jax.random.normal(k2, (c,), jnp.float32) * 0.1
        mean = jax.random.normal(k3, (c,), jnp.float32) * 0.1
        var = jax.random.uniform(k4, (c,), jnp.float32, 0.5, 1.5)
        return (gamma, beta, mean, var)

    p = {}
    p["conv1"] = jax.random.normal(keys[0], (planes, inplanes, 1, 1), jnp.float32) * 0.1
    p["bn1"] = bn_params(keys[1], planes)
    p["conv2"] = jax.random.normal(keys[2], (planes, planes, 3, 3), jnp.float32) * 0.1
    p["bn2"] = bn_params(keys[3], planes)
    p["conv3"] = jax.random.normal(keys[4], (planes * expansion, planes, 1, 1), jnp.float32) * 0.1
    p["bn3"] = bn_params(keys[5], planes * expansion)
    if stride > 1 or inplanes != planes * expansion:
        p["convd"] = jax.random.normal(keys[6], (planes * expansion, inplanes, 1, 1), jnp.float32) * 0.1
        p["bnd"] = bn_params(keys[7], planes * expansion)
    else:
        p["convd"] = None
    return p


# ----------------------------------- main ----------------------------------- #

if __name__ == "__main__":
    key = jax.random.PRNGKey(0)
    N, H, W = 2, 8, 8

    configs = [
        # (inplanes, planes, stride, compute_dtype, tolerance)
        (8, 4, 2, jnp.float32, 1e-3),    # strided block: fused conv2+pool, fused pooled downsample
        (8, 4, 1, jnp.float32, 1e-3),    # stride-1 block: conv2 w/o pool, matmul downsample
        (16, 4, 1, jnp.float32, 1e-3),   # no downsample: pure identity shortcut
        (8, 4, 2, jnp.bfloat16, 5e-2),   # bf16 MXU path (f32 accumulation)
    ]
    for idx, (inplanes, planes, stride, cdt, tol) in enumerate(configs):
        kx, kp_key = jax.random.split(jax.random.fold_in(key, idx))
        x = jax.random.normal(kx, (N, inplanes, H, W), dtype=jnp.float32)

        params = init_params(kp_key, inplanes, planes, stride)
        kernel_params = prep_kernel_params(params, cdt)

        out = jax.block_until_ready(
            bottleneck_forward(x, kernel_params, stride, compute_dtype=cdt))
        ref = ref_forward(x, params, stride)

        assert out.shape == ref.shape == (N, planes * 4, H // stride, W // stride)
        err = jnp.max(jnp.abs(out - ref))
        assert jnp.allclose(out, ref, rtol=tol, atol=tol), (
            f"config {idx}: max abs err {err}")

    print("KERNEL_OK")
</pallas_src>

<mosaic_0001>
module attributes {stable_mosaic.version = 11 : i64} {
  func.func @_matmul_bias_kernel(%arg0: i32, %arg1: memref<128x8xf32, #tpu.memory_space<vmem>>, %arg2: memref<8x128xf32, #tpu.memory_space<vmem>>, %arg3: memref<1x128xf32, #tpu.memory_space<vmem>>, %arg4: memref<128x128xf32, #tpu.memory_space<vmem>>) attributes {dimension_semantics = [#tpu.dimension_semantics<parallel>], iteration_bounds = array<i64: 1>, scalar_prefetch = 0 : i64, scratch_operands = 0 : i64, tpu.core_type = #tpu.core_type<tc>, window_params = [{transform_indices = @transform_0, window_bounds = array<i64: 128, 8>}, {pipeline_mode = #tpu.pipeline_mode<synchronous>, transform_indices = @transform_1, window_bounds = array<i64: 8, 128>}, {pipeline_mode = #tpu.pipeline_mode<synchronous>, transform_indices = @transform_2, window_bounds = array<i64: 1, 128>}, {transform_indices = @transform_3, window_bounds = array<i64: 128, 128>}]} {
    %c0 = arith.constant 0 : index
    %c0_0 = arith.constant 0 : index
    %0 = vector.load %arg1[%c0, %c0_0] : memref<128x8xf32, #tpu.memory_space<vmem>>, vector<128x8xf32>
    %c0_1 = arith.constant 0 : index
    %c0_2 = arith.constant 0 : index
    %1 = vector.load %arg2[%c0_1, %c0_2] : memref<8x128xf32, #tpu.memory_space<vmem>>, vector<8x128xf32>
    %cst = arith.constant dense<0.000000e+00> : vector<128x128xf32>
    %2 = tpu.matmul %0, %1, %cst {dimension_numbers = #tpu.dot_dimension_numbers<[1], [0], [0], [1], [0, 0, 1, 1], [], []>} : vector<128x8xf32>, vector<8x128xf32>, vector<128x128xf32> -> vector<128x128xf32>
    %c0_3 = arith.constant 0 : index
    %c0_4 = arith.constant 0 : index
    %3 = vector.load %arg3[%c0_3, %c0_4] : memref<1x128xf32, #tpu.memory_space<vmem>>, vector<1x128xf32>
    %4 = vector.broadcast %3 : vector<1x128xf32> to vector<128x128xf32>
    %5 = arith.addf %2, %4 : vector<128x128xf32>
    %cst_5 = arith.constant 0.000000e+00 : f32
    %6 = vector.broadcast %cst_5 : f32 to vector<128x128xf32>
    %7 = arith.maximumf %5, %6 : vector<128x128xf32>
    %c0_6 = arith.constant 0 : index
    %c0_7 = arith.constant 0 : index
    %8 = vector.load %arg4[%c0_6, %c0_7] : memref<128x128xf32, #tpu.memory_space<vmem>>, vector<128x128xf32>
    tpu.vector_store %arg4[%c0_6, %c0_7], %7 {strides = array<i32>} : memref<128x128xf32, #tpu.memory_space<vmem>>, vector<128x128xf32>,
    return
  }
  func.func @transform_0(%arg0: i32) -> (i32, i32) {
    %c0_i32 = arith.constant 0 : i32
    %c0_i32_0 = arith.constant 0 : i32
    return %arg0, %c0_i32 : i32, i32
  }
  func.func @transform_1(%arg0: i32) -> (i32, i32) {
    %c0_i32 = arith.constant 0 : i32
    %c0_i32_0 = arith.constant 0 : i32
    %c0_i32_1 = arith.constant 0 : i32
    return %c0_i32, %c0_i32_0 : i32, i32
  }
  func.func @transform_2(%arg0: i32) -> (i32, i32) {
    %c0_i32 = arith.constant 0 : i32
    %c0_i32_0 = arith.constant 0 : i32
    %c0_i32_1 = arith.constant 0 : i32
    return %c0_i32, %c0_i32_0 : i32, i32
  }
  func.func @transform_3(%arg0: i32) -> (i32, i32) {
    %c0_i32 = arith.constant 0 : i32
    %c0_i32_0 = arith.constant 0 : i32
    return %arg0, %c0_i32 : i32, i32
  }
}

</mosaic_0001>

<bundles_post_ra>
// kernel: tpu_custom_call.1
= control target key start
LH: loop header
LB: loop body
LE: loop exit
PB: predicated region body
PF: predicated region fallthrough
CT: control target
= control target key end

     0   :  { %vm36_vm0 = vcmask 64512   ;;  %s345_s0 = inlined_call_operand.vmem [shape: f32[128,8], index: 0, kind: input, shape index: {}]   ;;  %s346_s1 = inlined_call_operand.vmem [shape: f32[8,128], index: 1, kind: input, shape index: {}]   ;;  %s347_s2 = inlined_call_operand.vmem [shape: f32[1,128], index: 2, kind: input, shape index: {}]   ;;  %s348_s3 = inlined_call_operand.hbm [shape: f32[128,128], index: 3, kind: output, shape index: {}]  }
   0x1   :  { %v31_v0 = vld [vmem:[%s346_s1] sm:$0xff] }
   0x2   :  { %v23_v1 = vld [vmem:[%s345_s0 + $0x40] sm:$0xff]  ;;  %217 = vmatpush.msra.mxu2 %v31_v0  ;;  %218 = vmatpush.msra.mxu3 %v31_v0 }
   0x3   :  { %v27_v2 = vld [vmem:[%s345_s0 + $0x60] sm:$0xff]  ;;  %208 = vmatmul.msk.f32.vlgmr.msra.gmra.mxu2 %vm36_vm0, %v23_v1  ;;  %100 = vmatpush.msra.mxu0 %v31_v0 }
   0x4   :  { %v15_v3 = vld [vmem:[%s345_s0] sm:$0xff]  ;;  %212 = vmatmul.msk.f32.vlgmr.msra.gmra.mxu3 %vm36_vm0, %v27_v2  ;;  %216 = vmatpush.msra.mxu1 %v31_v0 }
   0x5   :  { %v19_v4 = vld [vmem:[%s345_s0 + $0x20] sm:$0xff]  ;;  %200 = vmatmul.msk.f32.vlgmr.msra.gmra.mxu0 %vm36_vm0, %v15_v3 }
   0x6   :  { %204 = vmatmul.msk.f32.vlgmr.msra.gmra.mxu1 %vm36_vm0, %v19_v4 }
   0x7   :  { %8 = vsyncpa [#allocation3], 0  ;;  %v24_v5 = vld [vmem:[%s345_s0 + $0x48] sm:$0xff]  ;;  %v25_v9 = vld [vmem:[%s345_s0 + $0x50] sm:$0xff]  ;;  %s188_s1 = sshll.u32 %s348_s3, 4  ;;  %s250_s22 = smov 128   ;;  %s189_s1 = int_to_ptr.hbm [resolvable:$true] %s188_s1 }
   0x8   :  { %v28_v6 = vld [vmem:[%s345_s0 + $0x68] sm:$0xff]  ;;  %v29_v10 = vld [vmem:[%s345_s0 + $0x70] sm:$0xff]  ;;  %v26_v13 = vld [vmem:[%s345_s0 + $0x58] sm:$0xff]  ;;  %s251_s23 = smov 8  }
   0x9   :  { %v16_v7 = vld [vmem:[%s345_s0 + $0x8] sm:$0xff]  ;;  %v17_v11 = vld [vmem:[%s345_s0 + $0x10] sm:$0xff]  ;;  %v30_v14 = vld [vmem:[%s345_s0 + $0x78] sm:$0xff] }
   0xa   :  { %v20_v8 = vld [vmem:[%s345_s0 + $0x28] sm:$0xff]  ;;  %v21_v12 = vld [vmem:[%s345_s0 + $0x30] sm:$0xff]  ;;  %v18_v15 = vld [vmem:[%s345_s0 + $0x18] sm:$0xff] }
   0xb   :  { %209 = vmatmul.msk.f32.gmra.mxu2 %vm36_vm0, %v24_v5  ;;  %v22_v16 = vld [vmem:[%s345_s0 + $0x38] sm:$0xff]  ;;  %v222_v17 = vld [vmem:[%s347_s2] ss:$0 sm:$0xff]  ;;  %s249_s0 = smov [#allocation2]  }
   0xc   :  { %213 = vmatmul.msk.f32.gmra.mxu3 %vm36_vm0, %v28_v6  ;;  %s186_s2 = sshll.u32 %s249_s0, 4  ;;  %s187_s2 = int_to_ptr.vmem [resolvable:$true] %s186_s2 }
   0xd   :  { %201 = vmatmul.msk.f32.gmra.mxu0 %vm36_vm0, %v16_v7 }
   0xe   :  { %205 = vmatmul.msk.f32.gmra.mxu1 %vm36_vm0, %v20_v8 }
  0x13   :  { %210 = vmatmul.msk.f32.gmra.mxu2 %vm36_vm0, %v25_v9 }
  0x14   :  { %214 = vmatmul.msk.f32.gmra.mxu3 %vm36_vm0, %v29_v10 }
  0x15   :  { %202 = vmatmul.msk.f32.gmra.mxu0 %vm36_vm0, %v17_v11 }
  0x16   :  { %206 = vmatmul.msk.f32.gmra.mxu1 %vm36_vm0, %v21_v12 }
  0x1b   :  { %211 = vmatmul.msk.f32.gmra.mxu2 %vm36_vm0, %v26_v13 }
  0x1c   :  { %215 = vmatmul.msk.f32.gmra.mxu3 %vm36_vm0, %v30_v14 }
  0x1d   :  { %203 = vmatmul.msk.f32.gmra.mxu0 %vm36_vm0, %v18_v15 }
  0x1e   :  { %207 = vmatmul.msk.f32.gmra.mxu1 %vm36_vm0, %v22_v16 }
  0x82   :  { %v102_v18 = vpop.f32.mrf.mxu0 }
  0x83   :  { %v114_v19 = vpop.f32.mrf.mxu1  ;;  %v103_v20 = vadd.f32 %v222_v17, %v102_v18 }
  0x84   :  { %v115_v21 = vadd.f32 %v222_v17, %v114_v19 }
  0x85   :  { %v150_v22 = vmax.f32 %v103_v20, 0.0 }
  0x86   :  { %v154_v23 = vmax.f32 %v115_v21, 0.0  ;;  %v126_v24 = vpop.f32.mrf.mxu2 }
  0x87   :  { %v138_v25 = vpop.f32.mrf.mxu3  ;;  %166 = vst [vmem:[#allocation2] sm:$0xff] %v150_v22  ;;  %v127_v26 = vadd.f32 %v222_v17, %v126_v24 }
  0x88   :  { %v139_v27 = vadd.f32 %v222_v17, %v138_v25  ;;  %170 = vst [vmem:[#allocation2 + $0x20] sm:$0xff] %v154_v23 }
  0x89   :  { %v158_v28 = vmax.f32 %v127_v26, 0.0 }
  0x8a   :  { %v162_v29 = vmax.f32 %v139_v27, 0.0  ;;  %v105_v30 = vpop.f32.mrf.mxu0 }
  0x8b   :  { %v117_v31 = vpop.f32.mrf.mxu1  ;;  %174 = vst [vmem:[#allocation2 + $0x40] sm:$0xff] %v158_v28  ;;  %v106_v32 = vadd.f32 %v222_v17, %v105_v30 }
  0x8c   :  { %v118_v33 = vadd.f32 %v222_v17, %v117_v31  ;;  %178 = vst [vmem:[#allocation2 + $0x60] sm:$0xff] %v162_v29 }
  0x8d   :  { %v151_v34 = vmax.f32 %v106_v32, 0.0 }
  0x8e   :  { %v155_v35 = vmax.f32 %v118_v33, 0.0  ;;  %v129_v36 = vpop.f32.mrf.mxu2 }
  0x8f   :  { %v141_v37 = vpop.f32.mrf.mxu3  ;;  %167 = vst [vmem:[#allocation2 + $0x8] sm:$0xff] %v151_v34  ;;  %v130_v38 = vadd.f32 %v222_v17, %v129_v36 }
  0x90   :  { %v142_v39 = vadd.f32 %v222_v17, %v141_v37  ;;  %171 = vst [vmem:[#allocation2 + $0x28] sm:$0xff] %v155_v35 }
  0x91   :  { %v159_v40 = vmax.f32 %v130_v38, 0.0 }
  0x92   :  { %v163_v41 = vmax.f32 %v142_v39, 0.0  ;;  %v108_v42 = vpop.f32.mrf.mxu0 }
  0x93   :  { %v120_v43 = vpop.f32.mrf.mxu1  ;;  %175 = vst [vmem:[#allocation2 + $0x48] sm:$0xff] %v159_v40  ;;  %v109_v44 = vadd.f32 %v222_v17, %v108_v42 }
  0x94   :  { %v121_v45 = vadd.f32 %v222_v17, %v120_v43  ;;  %179 = vst [vmem:[#allocation2 + $0x68] sm:$0xff] %v163_v41 }
  0x95   :  { %v152_v46 = vmax.f32 %v109_v44, 0.0 }
  0x96   :  { %v156_v47 = vmax.f32 %v121_v45, 0.0  ;;  %v132_v48 = vpop.f32.mrf.mxu2 }
  0x97   :  { %v144_v49 = vpop.f32.mrf.mxu3  ;;  %168 = vst [vmem:[#allocation2 + $0x10] sm:$0xff] %v152_v46  ;;  %v133_v50 = vadd.f32 %v222_v17, %v132_v48 }
  0x98   :  { %v145_v51 = vadd.f32 %v222_v17, %v144_v49  ;;  %172 = vst [vmem:[#allocation2 + $0x30] sm:$0xff] %v156_v47 }
  0x99   :  { %v160_v52 = vmax.f32 %v133_v50, 0.0 }
  0x9a   :  { %v164_v53 = vmax.f32 %v145_v51, 0.0  ;;  %v111_v54 = vpop.f32.mrf.mxu0 }
  0x9b   :  { %v123_v55 = vpop.f32.mrf.mxu1  ;;  %176 = vst [vmem:[#allocation2 + $0x50] sm:$0xff] %v160_v52  ;;  %v112_v56 = vadd.f32 %v222_v17, %v111_v54 }
  0x9c   :  { %v124_v57 = vadd.f32 %v222_v17, %v123_v55  ;;  %180 = vst [vmem:[#allocation2 + $0x70] sm:$0xff] %v164_v53 }
  0x9d   :  { %v153_v58 = vmax.f32 %v112_v56, 0.0 }
  0x9e   :  { %v157_v59 = vmax.f32 %v124_v57, 0.0  ;;  %v135_v60 = vpop.f32.mrf.mxu2 }
  0x9f   :  { %v147_v61 = vpop.f32.mrf.mxu3  ;;  %169 = vst [vmem:[#allocation2 + $0x18] sm:$0xff] %v153_v58  ;;  %v136_v62 = vadd.f32 %v222_v17, %v135_v60 }
  0xa0   :  { %v148_v63 = vadd.f32 %v222_v17, %v147_v61  ;;  %173 = vst [vmem:[#allocation2 + $0x38] sm:$0xff] %v157_v59 }
  0xa1   :  { %v161_v0 = vmax.f32 %v136_v62, 0.0 }
  0xa2   :  { %v165_v1 = vmax.f32 %v148_v63, 0.0 }
  0xa3   :  { %177 = vst [vmem:[#allocation2 + $0x58] sm:$0xff] %v161_v0 }
  0xa4   :  { %181 = vst [vmem:[#allocation2 + $0x78] sm:$0xff] %v165_v1 }
  0xa5   :  { %194 = dma.vmem_to_hbm [thread:$0]  %s187_s2, 2048, %s189_s1, [#allocation3], %s250_s22, %s250_s22, %s251_s23  }
  0xa6   :  { %247 = dma.done.wait [#allocation3], 2048  }
  0xa7   :  { %248 = vsyncadd [#allocation3], 4294965248 }
  0xa8   :  { %199 = vsyncpa [#allocation3], 1 }

</bundles_post_ra>
